<compile_context>
chip_gen: v5e
topology: v5e:2x2
jax: 0.10.0
libtpu: 0.0.40
codegen_flags: <defaults>
</compile_context>

<pallas_src>
import functools

import jax
import jax.numpy as jnp
from jax.experimental import pallas as pl
from jax.experimental.pallas import tpu as pltpu

# ----------------------------- configuration --------------------------------
SCALE = 8                                              # channel scale-down vs. real ResNet-101
STEM = 64 // SCALE                                     # 8
STAGE_C = [c // SCALE for c in (256, 512, 1024, 2048)]  # [32, 64, 128, 256]
BLOCKS = (2, 2, 2, 2)                                  # real ResNet-101: (3, 4, 23, 3)
NUM_CLASSES = 1000                                     # resnet101's own fc output size


def _round_up(x, m):
    return (x + m - 1) // m * m


_VMEM_SPEC = pl.BlockSpec(memory_space=pltpu.MemorySpace.VMEM)


# ------------- fused matmul + BN/bias (+ residual) (+ ReLU) kernel -----------
def _mm_kernel(a_ref, b_ref, s_ref, t_ref, o_ref, *, relu):
    y = jnp.dot(a_ref[...], b_ref[...], preferred_element_type=jnp.float32)
    y = y * s_ref[...] + t_ref[...]
    if relu:
        y = jnp.maximum(y, 0.0)
    o_ref[...] = y


def _mm_res_kernel(a_ref, b_ref, s_ref, t_ref, r_ref, o_ref, *, relu):
    y = jnp.dot(a_ref[...], b_ref[...], preferred_element_type=jnp.float32)
    y = y * s_ref[...] + t_ref[...] + r_ref[...]
    if relu:
        y = jnp.maximum(y, 0.0)
    o_ref[...] = y


def fused_matmul(a, b, scale, shift, res=None, relu=False):
    """(M,K)@(K,N) on the MXU with bf16 operands / f32 accumulation.

    The per-column scale/shift (folded BN or bias), an optional residual add
    and an optional ReLU are fused into the epilogue.  Full-K / full-N blocks,
    1-D grid over M (tm up to 512), so no K-loop or accumulator is needed and
    the output is written exactly once, lane-dense (N padded to 128)."""
    M, K = a.shape
    N = b.shape[1]
    tm = min(512, _round_up(M, 8))
    Mp = _round_up(M, tm)
    Kp = _round_up(K, 128)
    Np = _round_up(N, 128)
    a_p = jnp.pad(a, ((0, Mp - M), (0, Kp - K))).astype(jnp.bfloat16)
    b_p = jnp.pad(b, ((0, Kp - K), (0, Np - N))).astype(jnp.bfloat16)
    s_p = jnp.pad(scale.astype(jnp.float32), (0, Np - N)).reshape(1, Np)
    t_p = jnp.pad(shift.astype(jnp.float32), (0, Np - N)).reshape(1, Np)

    in_specs = [pl.BlockSpec((tm, Kp), lambda i: (i, 0)),
                pl.BlockSpec((Kp, Np), lambda i: (0, 0)),
                pl.BlockSpec((1, Np), lambda i: (0, 0)),
                pl.BlockSpec((1, Np), lambda i: (0, 0))]
    args = [a_p, b_p, s_p, t_p]
    if res is None:
        kernel = functools.partial(_mm_kernel, relu=relu)
    else:
        r_p = jnp.pad(res.astype(jnp.float32), ((0, Mp - M), (0, Np - N)))
        in_specs.append(pl.BlockSpec((tm, Np), lambda i: (i, 0)))
        args.append(r_p)
        kernel = functools.partial(_mm_res_kernel, relu=relu)

    out = pl.pallas_call(
        kernel,
        out_shape=jax.ShapeDtypeStruct((Mp, Np), jnp.float32),
        grid=(Mp // tm,),
        in_specs=in_specs,
        out_specs=pl.BlockSpec((tm, Np), lambda i: (i, 0)),
        compiler_params=pltpu.CompilerParams(dimension_semantics=("parallel",)),
    )(*args)
    return out[:M, :N]


# -------------------------------- conv + BN ----------------------------------
def _im2col_nhwc(x, kh, kw, stride, padding):
    """NHWC -> (N*Ho*Wo, kh*kw*Cin); column order (di, dj, cin) to match the
    PyTorch OIHW weight reshaped as transpose(2,3,1,0)."""
    n, h, w, c = x.shape
    ho = (h + 2 * padding - kh) // stride + 1
    wo = (w + 2 * padding - kw) // stride + 1
    xp = jnp.pad(x, ((0, 0), (padding, padding), (padding, padding), (0, 0)))
    cols = [xp[:, i:i + stride * ho:stride, j:j + stride * wo:stride, :]
            for i in range(kh) for j in range(kw)]      # each (n, ho, wo, c)
    pat = jnp.stack(cols, axis=3)                       # (n, ho, wo, kh*kw, c)
    return pat.reshape(n * ho * wo, kh * kw * c), ho, wo


@functools.partial(jax.jit, static_argnames=("stride", "padding", "relu"))
def conv_bn(x, w, bn_a, bn_b, res=None, *, stride, padding, relu):
    """Conv2d (bias=False, PyTorch OIHW weight) with folded eval-mode BatchNorm,
    optional fused residual add and ReLU.  NHWC in / NHWC out."""
    cout, cin, kh, kw = w.shape
    n = x.shape[0]
    if kh == 1 and kw == 1:
        xs = x if stride == 1 else x[:, ::stride, ::stride, :]
        ho, wo = xs.shape[1], xs.shape[2]
        pm = xs.reshape(n * ho * wo, cin)
        wm = w.reshape(cout, cin).T
    else:
        # TODO(synk): 3x3/7x7 patches are still materialized by XLA; folding
        # kh*kw into the matmul reduction via index_map offsets would avoid
        # this HBM copy.
        pm, ho, wo = _im2col_nhwc(x, kh, kw, stride, padding)
        wm = w.transpose(2, 3, 1, 0).reshape(kh * kw * cin, cout)
    res2 = None if res is None else res.reshape(n * ho * wo, cout)
    y = fused_matmul(pm, wm, bn_a, bn_b, res=res2, relu=relu)
    return y.reshape(n, ho, wo, cout)


def bottleneck(x, p):
    out = conv_bn(x, p['conv1_w'], p['bn1_a'], p['bn1_b'],
                  stride=1, padding=0, relu=True)
    out = conv_bn(out, p['conv2_w'], p['bn2_a'], p['bn2_b'],
                  stride=p['stride'], padding=1, relu=True)
    if 'down_w' in p:
        identity = conv_bn(x, p['down_w'], p['down_a'], p['down_b'],
                           stride=p['stride'], padding=0, relu=False)
    else:
        identity = x
    # conv3 + BN + residual add + ReLU all fused in the matmul epilogue.
    return conv_bn(out, p['conv3_w'], p['bn3_a'], p['bn3_b'], identity,
                   stride=1, padding=0, relu=True)


# -------------------------------- max pool -----------------------------------
def _max9_kernel(x_ref, o_ref):
    o_ref[...] = jnp.max(x_ref[...], axis=0, keepdims=True)


@jax.jit
def max_pool_3x3_s2(x):
    """nn.MaxPool2d(kernel_size=3, stride=2, padding=1) on NHWC input."""
    n, h, w, c = x.shape
    ho = (h + 2 - 3) // 2 + 1
    wo = (w + 2 - 3) // 2 + 1
    neg = jnp.finfo(jnp.float32).min
    xp = jnp.pad(x, ((0, 0), (1, 1), (1, 1), (0, 0)), constant_values=neg)
    # TODO(synk): the 9 shifted windows are stacked by XLA; an in-kernel
    # strided-read max over the padded input would avoid this (small) HBM copy.
    wins = [xp[:, i:i + 2 * ho:2, j:j + 2 * wo:2, :]
            for i in range(3) for j in range(3)]
    stacked = jnp.stack(wins, axis=0).reshape(9, n * ho * wo * c)
    out = pl.pallas_call(
        _max9_kernel,
        out_shape=jax.ShapeDtypeStruct((1, n * ho * wo * c), jnp.float32),
        in_specs=[_VMEM_SPEC],
        out_specs=_VMEM_SPEC,
    )(stacked)
    return out.reshape(n, ho, wo, c)


# --------------------------------- LSTM --------------------------------------
def _lstm_scan_kernel(gx_ref, whh_ref, o_ref, h_ref, c_ref, *, hidden):
    t = pl.program_id(1)

    @pl.when(t == 0)
    def _():
        h_ref[...] = jnp.zeros_like(h_ref)
        c_ref[...] = jnp.zeros_like(c_ref)

    h = h_ref[...]
    # single merged recurrent matmul: (B, H) @ (H, 4H), bf16 in / f32 out
    g = gx_ref[0, 0] + jnp.dot(h.astype(jnp.bfloat16), whh_ref[0],
                               preferred_element_type=jnp.float32)
    i_t = jax.nn.sigmoid(g[:, 0 * hidden:1 * hidden])
    f_t = jax.nn.sigmoid(g[:, 1 * hidden:2 * hidden])
    g_t = jnp.tanh(g[:, 2 * hidden:3 * hidden])
    o_t = jax.nn.sigmoid(g[:, 3 * hidden:4 * hidden])
    c_t = f_t * c_ref[...] + i_t * g_t
    h_t = o_t * jnp.tanh(c_t)
    c_ref[...] = c_t
    h_ref[...] = h_t
    o_ref[0, 0] = h_t


@jax.jit
def bi_lstm_layer(x, w_ih_f, w_hh_f, b_f, w_ih_r, w_hh_r, b_r):
    """One bidirectional nn.LSTM layer, zero init state.  x: (T, B, I) f32 ->
    (T, B, 2H) f32.  PyTorch gate order (i, f, g, o)."""
    T, B, _ = x.shape
    H = w_hh_f.shape[1]
    # Input-gate activations for BOTH directions in one MXU call.
    w_ih_both = jnp.concatenate([w_ih_f, w_ih_r], axis=0).T          # (I, 8H)
    b_both = jnp.concatenate([b_f, b_r], axis=0)                     # (8H,)
    ones = jnp.ones((8 * H,), jnp.float32)
    gx = fused_matmul(x.reshape(T * B, x.shape[2]), w_ih_both, ones, b_both)
    gx = gx.reshape(T, B, 2, 4 * H).transpose(2, 0, 1, 3)            # (2, T, B, 4H)
    whh = jnp.stack([w_hh_f.T, w_hh_r.T], axis=0).astype(jnp.bfloat16)  # (2, H, 4H)

    # Both directions in a single scan: grid = (direction, time).  The reverse
    # direction's time flip lives in the index_map (no XLA flips / copies) and
    # the direction axis is "parallel" so v7x can shard it across its 2 cores.
    def flip_idx(d, t):
        return (d, t + d * (T - 1 - 2 * t), 0, 0)

    hs = pl.pallas_call(
        functools.partial(_lstm_scan_kernel, hidden=H),
        out_shape=jax.ShapeDtypeStruct((2, T, B, H), jnp.float32),
        grid=(2, T),
        in_specs=[pl.BlockSpec((1, 1, B, 4 * H), flip_idx),
                  pl.BlockSpec((1, H, 4 * H), lambda d, t: (d, 0, 0))],
        out_specs=pl.BlockSpec((1, 1, B, H), flip_idx),
        scratch_shapes=[pltpu.VMEM((B, H), jnp.float32),
                        pltpu.VMEM((B, H), jnp.float32)],
        compiler_params=pltpu.CompilerParams(
            dimension_semantics=("parallel", "arbitrary")),
    )(gx, whh)
    return jnp.concatenate([hs[0], hs[1]], axis=-1)                  # (T, B, 2H)


def bi_lstm_2layers(x, layers):
    """nn.LSTM(input, hidden, num_layers=2, bidirectional=True), zero init."""
    out = x
    for lp in layers:
        out = bi_lstm_layer(out, lp['w_ih'], lp['w_hh'], lp['b'],
                            lp['w_ih_r'], lp['w_hh_r'], lp['b_r'])
    return out


def lstm_layer_apply(x, p):
    """Exact port of lstm_layer.forward, NHWC in / NHWC out."""
    n, h, w, c = x.shape
    x1 = jnp.transpose(x, (2, 0, 1, 3)).reshape(w, n * h, c)          # (w, n*h, c)
    y1 = bi_lstm_2layers(x1, p['lstm1'])                              # (w, n*h, c//2)
    y1 = jnp.transpose(y1.reshape(w, n, h, c // 2), (1, 2, 0, 3))     # (n, h, w, c//2)
    x2 = jnp.transpose(x, (1, 0, 2, 3)).reshape(h, n * w, c)          # (h, n*w, c)
    y2 = bi_lstm_2layers(x2, p['lstm2'])                              # (h, n*w, c//2)
    y2 = jnp.transpose(y2.reshape(h, n, w, c // 2), (1, 0, 2, 3))     # (n, h, w, c//2)
    return jnp.concatenate([y1, y2], axis=-1)                         # (n, h, w, c)


# ------------------------------- head ops ------------------------------------
def _avgpool_kernel(x_ref, o_ref):
    o_ref[...] = jnp.mean(x_ref[...], axis=1)


@jax.jit
def global_avg_pool(x):
    """AdaptiveAvgPool2d(1) on NHWC -> (N, C), done as a VPU row-mean."""
    n, h, w, c = x.shape
    return pl.pallas_call(
        _avgpool_kernel,
        out_shape=jax.ShapeDtypeStruct((n, c), jnp.float32),
        in_specs=[_VMEM_SPEC],
        out_specs=_VMEM_SPEC,
    )(x.reshape(n, h * w, c))


@jax.jit
def fc_apply(x, w, b):
    return fused_matmul(x, w.T, jnp.ones((w.shape[0],), jnp.float32), b)


# ------------------------------ parameter init -------------------------------
def _orthogonal(key, shape):
    rows, cols = shape
    big, small = max(rows, cols), min(rows, cols)
    a = jax.random.normal(key, (big, small), jnp.float32)
    q, r = jnp.linalg.qr(a)
    d = jnp.where(jnp.diagonal(r) >= 0, 1.0, -1.0)
    q = q * d[None, :]
    if rows < cols:
        q = q.T
    return q[:rows, :cols].astype(jnp.float32)


def _conv_init(key, cout, cin, k):
    std = (2.0 / (cin * k * k)) ** 0.5
    return std * jax.random.normal(key, (cout, cin, k, k), jnp.float32)


def _bn_init(key, c):
    k1, k2, k3, k4 = jax.random.split(key, 4)
    gamma = 1.0 + 0.1 * jax.random.normal(k1, (c,), jnp.float32)
    beta = 0.1 * jax.random.normal(k2, (c,), jnp.float32)
    mean = 0.1 * jax.random.normal(k3, (c,), jnp.float32)
    var = jax.random.uniform(k4, (c,), jnp.float32, 0.5, 1.5)
    a = gamma / jnp.sqrt(var + 1e-5)
    b = beta - mean * a
    return a, b


def _init_bottleneck(key, cin, width, cout, stride, downsample):
    ks = jax.random.split(key, 8)
    p = {'stride': stride}
    p['conv1_w'] = _conv_init(ks[0], width, cin, 1)
    p['bn1_a'], p['bn1_b'] = _bn_init(ks[1], width)
    p['conv2_w'] = _conv_init(ks[2], width, width, 3)
    p['bn2_a'], p['bn2_b'] = _bn_init(ks[3], width)
    p['conv3_w'] = _conv_init(ks[4], cout, width, 1)
    p['bn3_a'], p['bn3_b'] = _bn_init(ks[5], cout)
    if downsample:
        p['down_w'] = _conv_init(ks[6], cout, cin, 1)
        p['down_a'], p['down_b'] = _bn_init(ks[7], cout)
    return p


def _init_lstm_stack(key, c):
    """nn.LSTM(c, c//4, num_layers=2, bidirectional=True); weights orthogonal, biases 0."""
    h = c // 4
    layers = []
    for layer in range(2):
        in_dim = c if layer == 0 else 2 * h
        k = jax.random.split(key, 5)
        key = k[0]
        layers.append({
            'w_ih': _orthogonal(k[1], (4 * h, in_dim)),
            'w_hh': _orthogonal(k[2], (4 * h, h)),
            'b': jnp.zeros((4 * h,), jnp.float32),        # bias_ih + bias_hh (zeroed)
            'w_ih_r': _orthogonal(k[3], (4 * h, in_dim)),
            'w_hh_r': _orthogonal(k[4], (4 * h, h)),
            'b_r': jnp.zeros((4 * h,), jnp.float32),
        })
    return layers


def _init_lstm_layer(key, c):
    k1, k2 = jax.random.split(key)
    return {'lstm1': _init_lstm_stack(k1, c), 'lstm2': _init_lstm_stack(k2, c)}


def init_params(key):
    keys = iter(jax.random.split(key, 64))
    params = {}
    params['conv1_w'] = _conv_init(next(keys), STEM, 3, 7)
    params['bn1_a'], params['bn1_b'] = _bn_init(next(keys), STEM)
    stages, lstms = [], []
    cin = STEM
    for s in range(4):
        cout = STAGE_C[s]
        width = cout // 4
        blocks = []
        for b in range(BLOCKS[s]):
            stride = (1 if s == 0 else 2) if b == 0 else 1
            blocks.append(_init_bottleneck(next(keys), cin if b == 0 else cout,
                                           width, cout, stride, downsample=(b == 0)))
        stages.append(blocks)
        lstms.append(_init_lstm_layer(next(keys), cout))
        cin = cout
    params['stages'] = stages
    params['lstm'] = lstms
    params['fc_w'] = (1.0 / (STAGE_C[-1] ** 0.5)) * jax.random.normal(
        next(keys), (NUM_CLASSES, STAGE_C[-1]), jnp.float32)
    params['fc_b'] = jnp.zeros((NUM_CLASSES,), jnp.float32)
    return params


# --------------------------------- forward -----------------------------------
def forward(x, params):
    """Mirrors resnet_lstm_contex.forward: iterate resnet children; after each
    layer{1..4} apply lstm_layer[i-4]; finish with resnet's own fc."""
    x = jnp.transpose(x, (0, 2, 3, 1))                     # NCHW -> NHWC (once)
    x = conv_bn(x, params['conv1_w'], params['bn1_a'], params['bn1_b'],
                stride=2, padding=3, relu=True)            # conv1 + bn1 + relu
    x = max_pool_3x3_s2(x)                                 # maxpool
    for s in range(4):                                     # layer1..layer4
        for bp in params['stages'][s]:
            x = bottleneck(x, bp)
        x = lstm_layer_apply(x, params['lstm'][s])         # lstm_layer[s]
    x = global_avg_pool(x)                                 # avgpool -> (N, C)
    x = fc_apply(x, params['fc_w'], params['fc_b'])        # resnet's fc
    return x


# ----------------------------------- main -------------------------------------
if __name__ == "__main__":
    key = jax.random.PRNGKey(0)
    pkey, xkey = jax.random.split(key)
    params = init_params(pkey)
    x = jax.random.normal(xkey, (2, 3, 64, 64), jnp.float32)   # NCHW, like PyTorch
    out = forward(x, params)
    out = jax.block_until_ready(out)
    assert out.shape == (2, NUM_CLASSES), out.shape
    assert bool(jnp.all(jnp.isfinite(out)))
    print("KERNEL_OK")
</pallas_src>

<mosaic_0001>
module attributes {stable_mosaic.version = 11 : i64} {
  func.func @_mm_kernel(%arg0: i32, %arg1: memref<512x256xbf16, #tpu.memory_space<vmem>>, %arg2: memref<256x128xbf16, #tpu.memory_space<vmem>>, %arg3: memref<1x128xf32, #tpu.memory_space<vmem>>, %arg4: memref<1x128xf32, #tpu.memory_space<vmem>>, %arg5: memref<512x128xf32, #tpu.memory_space<vmem>>) attributes {dimension_semantics = [#tpu.dimension_semantics<parallel>], iteration_bounds = array<i64: 4>, scalar_prefetch = 0 : i64, scratch_operands = 0 : i64, tpu.core_type = #tpu.core_type<tc>, window_params = [{transform_indices = @transform_0, window_bounds = array<i64: 512, 256>}, {pipeline_mode = #tpu.pipeline_mode<synchronous>, transform_indices = @transform_1, window_bounds = array<i64: 256, 128>}, {pipeline_mode = #tpu.pipeline_mode<synchronous>, transform_indices = @transform_2, window_bounds = array<i64: 1, 128>}, {pipeline_mode = #tpu.pipeline_mode<synchronous>, transform_indices = @transform_3, window_bounds = array<i64: 1, 128>}, {transform_indices = @transform_4, window_bounds = array<i64: 512, 128>}]} {
    %c0 = arith.constant 0 : index
    %c0_0 = arith.constant 0 : index
    %0 = vector.load %arg1[%c0, %c0_0] : memref<512x256xbf16, #tpu.memory_space<vmem>>, vector<512x256xbf16>
    %c0_1 = arith.constant 0 : index
    %c0_2 = arith.constant 0 : index
    %1 = vector.load %arg2[%c0_1, %c0_2] : memref<256x128xbf16, #tpu.memory_space<vmem>>, vector<256x128xbf16>
    %cst = arith.constant dense<0.000000e+00> : vector<512x128xf32>
    %2 = tpu.matmul %0, %1, %cst {dimension_numbers = #tpu.dot_dimension_numbers<[1], [0], [0], [1], [0, 0, 1, 1], [], []>} : vector<512x256xbf16>, vector<256x128xbf16>, vector<512x128xf32> -> vector<512x128xf32>
    %c0_3 = arith.constant 0 : index
    %c0_4 = arith.constant 0 : index
    %3 = vector.load %arg3[%c0_3, %c0_4] : memref<1x128xf32, #tpu.memory_space<vmem>>, vector<1x128xf32>
    %4 = vector.broadcast %3 : vector<1x128xf32> to vector<512x128xf32>
    %5 = arith.mulf %2, %4 : vector<512x128xf32>
    %c0_5 = arith.constant 0 : index
    %c0_6 = arith.constant 0 : index
    %6 = vector.load %arg4[%c0_5, %c0_6] : memref<1x128xf32, #tpu.memory_space<vmem>>, vector<1x128xf32>
    %7 = vector.broadcast %6 : vector<1x128xf32> to vector<512x128xf32>
    %8 = arith.addf %5, %7 : vector<512x128xf32>
    %cst_7 = arith.constant 0.000000e+00 : f32
    %9 = vector.broadcast %cst_7 : f32 to vector<512x128xf32>
    %10 = arith.maximumf %8, %9 : vector<512x128xf32>
    %c0_8 = arith.constant 0 : index
    %c0_9 = arith.constant 0 : index
    %11 = vector.load %arg5[%c0_8, %c0_9] : memref<512x128xf32, #tpu.memory_space<vmem>>, vector<512x128xf32>
    tpu.vector_store %arg5[%c0_8, %c0_9], %10 {strides = array<i32>} : memref<512x128xf32, #tpu.memory_space<vmem>>, vector<512x128xf32>,
    return
  }
  func.func @transform_0(%arg0: i32) -> (i32, i32) {
    %c0_i32 = arith.constant 0 : i32
    %c0_i32_0 = arith.constant 0 : i32
    return %arg0, %c0_i32 : i32, i32
  }
  func.func @transform_1(%arg0: i32) -> (i32, i32) {
    %c0_i32 = arith.constant 0 : i32
    %c0_i32_0 = arith.constant 0 : i32
    %c0_i32_1 = arith.constant 0 : i32
    return %c0_i32, %c0_i32_0 : i32, i32
  }
  func.func @transform_2(%arg0: i32) -> (i32, i32) {
    %c0_i32 = arith.constant 0 : i32
    %c0_i32_0 = arith.constant 0 : i32
    %c0_i32_1 = arith.constant 0 : i32
    return %c0_i32, %c0_i32_0 : i32, i32
  }
  func.func @transform_3(%arg0: i32) -> (i32, i32) {
    %c0_i32 = arith.constant 0 : i32
    %c0_i32_0 = arith.constant 0 : i32
    %c0_i32_1 = arith.constant 0 : i32
    return %c0_i32, %c0_i32_0 : i32, i32
  }
  func.func @transform_4(%arg0: i32) -> (i32, i32) {
    %c0_i32 = arith.constant 0 : i32
    %c0_i32_0 = arith.constant 0 : i32
    return %arg0, %c0_i32 : i32, i32
  }
}

</mosaic_0001>

<bundles_post_ra>
// kernel: conv_bn.1
= control target key start
LH: loop header
LB: loop body
LE: loop exit
PB: predicated region body
PF: predicated region fallthrough
CT: control target
= control target key end

     0   :  { %s1848_s15 = smov 0   ;;  %s2245_s0 = inlined_call_operand.vmem [shape: bf16[2048,256], index: 0, kind: input, shape index: {}]   ;;  %s2246_s1 = inlined_call_operand.vmem [shape: bf16[256,128], index: 1, kind: input, shape index: {}]   ;;  %s2247_s2 = inlined_call_operand.vmem [shape: f32[1,128], index: 2, kind: input, shape index: {}]   ;;  %s2248_s3 = inlined_call_operand.vmem [shape: f32[1,128], index: 3, kind: input, shape index: {}]   ;;  %s2249_s4 = inlined_call_operand.vmem [shape: f32[2048,128], index: 4, kind: output, shape index: {}]  }
   0x1 LB: > { %s1374_s16 = sadd.s32 4294967295, %s1821_s15   ;;  %p1378_p0 = scmp.ge.s32.totalorder %s1821_s15, 1  ;;  %s1821_s15 = sphi %s1848_s15, %s14_s15  }
   0x2   : > { %p164_p1 = scmp.lt.s32.totalorder %s1821_s15, 5 }
   0x4   : > { %p165_p2 = pnand %p1378_p0, %p164_p1 }
   0x5   : > { %s1379_s29 = sshll.u32 (!%p165_p2), %s1374_s16, 6 }
   0x6   : > { %168 = sbr.rel (%p165_p2) target bundleno = 433 (0x1b1), region = 36  ;;  %p192_p3 = scmp.lt.s32.totalorder (!%p165_p2), %s1379_s29, 255 }
   0xb   : > { %v1778_v0 = vld [vmem:[%s2246_s1 + $0x38] sm:$0xff]  ;;  %v1777_v2 = vld [vmem:[%s2246_s1 + $0x30] sm:$0xff]  ;;  %v1776_v4 = vld [vmem:[%s2246_s1 + $0x28] sm:$0xff]  ;;  %s2251_s29 = smov (!%p192_p3, %s1379_s29), 255 }
   0xc   : > { %v1786_v1 = vld [vmem:[%s2246_s1 + $0x78] sm:$0xff]  ;;  %716 = vmatpush.bf16.msra.mxu0 %v1778_v0  ;;  %1787 = vmatpush.bf16.msra.mxu2 %v1778_v0  ;;  %v1785_v3 = vld [vmem:[%s2246_s1 + $0x70] sm:$0xff]  ;;  %v1784_v5 = vld [vmem:[%s2246_s1 + $0x68] sm:$0xff]  ;;  %s1706_s17 = sshll.u32 %s2251_s29, 3 }
   0xd   : > { %885 = vmatpush.bf16.msra.mxu1 %v1786_v1  ;;  %1795 = vmatpush.bf16.msra.mxu3 %v1786_v1  ;;  %v1775_v6 = vld [vmem:[%s2246_s1 + $0x20] sm:$0xff]  ;;  %v1774_v8 = vld [vmem:[%s2246_s1 + $0x18] sm:$0xff]  ;;  %v1773_v10 = vld [vmem:[%s2246_s1 + $0x10] sm:$0xff]  ;;  %s1903_s22 = scalar_lea.vmem %s2245_s0, %s1706_s17  ;;  %s2003_s10 = scalar_lea.vmem %s2249_s4, %s1706_s17 }
   0xe   : > { %v1783_v7 = vld [vmem:[%s2246_s1 + $0x60] sm:$0xff]  ;;  %v1782_v9 = vld [vmem:[%s2246_s1 + $0x58] sm:$0xff]  ;;  %v1781_v11 = vld [vmem:[%s2246_s1 + $0x50] sm:$0xff] }
   0xf   : > { %v1772_v12 = vld [vmem:[%s2246_s1 + $0x8] sm:$0xff]  ;;  %v1771_v14 = vld [vmem:[%s2246_s1] sm:$0xff]  ;;  %v1394_v28 = vld [vmem:[%s1903_s22 + $0x10] sm:$0xf] }
  0x10   : > { %717 = vmatpush.bf16.msra.mxu0 %v1777_v2  ;;  %1788 = vmatpush.bf16.msra.mxu2 %v1777_v2  ;;  %v1780_v13 = vld [vmem:[%s2246_s1 + $0x48] sm:$0xff]  ;;  %v1779_v15 = vld [vmem:[%s2246_s1 + $0x40] sm:$0xff]  ;;  %v1710_v29 = vld [vmem:[%s1903_s22 + $0x14] sm:$0xf0] }
  0x11   : > { %886 = vmatpush.bf16.msra.mxu1 %v1785_v3  ;;  %1796 = vmatpush.bf16.msra.mxu3 %v1785_v3  ;;  %v1386_v16 = vld [vmem:[%s1903_s22] sm:$0xf]  ;;  %v1708_v17 = vld [vmem:[%s1903_s22 + $0x4] sm:$0xf0]  ;;  %v1707_v20 = vld [vmem:[%s1903_s22 + $0x4] sm:$0xf]  ;;  %v1395_v36 = vor.u32 %v1710_v29, %v1394_v28 }
  0x12   : > { %v1514_v18 = vld [vmem:[%s1903_s22 + $0x100] sm:$0xf]  ;;  %v1740_v19 = vld [vmem:[%s1903_s22 + $0x104] sm:$0xf0]  ;;  %v1388_v21 = vld [vmem:[%s1903_s22 + $0x8] sm:$0xf0]  ;;  %v1387_v24 = vor.u32 %v1708_v17, %v1386_v16 }
  0x13   : > { %v1739_v22 = vld [vmem:[%s1903_s22 + $0x104] sm:$0xf]  ;;  %v1516_v23 = vld [vmem:[%s1903_s22 + $0x108] sm:$0xf0]  ;;  %v1515_v25 = vor.u32 %v1740_v19, %v1514_v18  ;;  %v1391_v26 = vor.u32 %v1707_v20, %v1388_v21  ;;  %v1522_v30 = vld [vmem:[%s1903_s22 + $0x110] sm:$0xf] }
  0x14   : > { %718 = vmatpush.bf16.msra.mxu0 %v1776_v4  ;;  %1789 = vmatpush.bf16.msra.mxu2 %v1776_v4  ;;  %v1519_v27 = vor.u32 %v1739_v22, %v1516_v23  ;;  %v1742_v31 = vld [vmem:[%s1903_s22 + $0x114] sm:$0xf0]  ;;  %v1709_v32 = vld [vmem:[%s1903_s22 + $0x14] sm:$0xf]  ;;  %v1396_v33 = vld [vmem:[%s1903_s22 + $0x18] sm:$0xf0] }
  0x15   : > { %887 = vmatpush.bf16.msra.mxu1 %v1784_v5  ;;  %1797 = vmatpush.bf16.msra.mxu3 %v1784_v5  ;;  %v1741_v34 = vld [vmem:[%s1903_s22 + $0x114] sm:$0xf]  ;;  %v1524_v35 = vld [vmem:[%s1903_s22 + $0x118] sm:$0xf0]  ;;  %v1523_v37 = vor.u32 %v1742_v31, %v1522_v30  ;;  %v1399_v38 = vor.u32 %v1709_v32, %v1396_v33  ;;  %v1402_v40 = vld [vmem:[%s1903_s22 + $0x20] sm:$0xf] }
  0x16   : > { %v1527_v39 = vor.u32 %v1741_v34, %v1524_v35  ;;  %v1712_v41 = vld [vmem:[%s1903_s22 + $0x24] sm:$0xf0]  ;;  %v1530_v42 = vld [vmem:[%s1903_s22 + $0x120] sm:$0xf]  ;;  %v1711_v44 = vld [vmem:[%s1903_s22 + $0x24] sm:$0xf] }
  0x17   : > { %v1744_v43 = vld [vmem:[%s1903_s22 + $0x124] sm:$0xf0]  ;;  %v1404_v45 = vld [vmem:[%s1903_s22 + $0x28] sm:$0xf0]  ;;  %v1743_v46 = vld [vmem:[%s1903_s22 + $0x124] sm:$0xf]  ;;  %v1403_v48 = vor.u32 %v1712_v41, %v1402_v40 }
  0x18   : > { %719 = vmatpush.bf16.msra.mxu0 %v1775_v6  ;;  %1790 = vmatpush.bf16.msra.mxu2 %v1775_v6  ;;  %v1532_v47 = vld [vmem:[%s1903_s22 + $0x128] sm:$0xf0]  ;;  %v1531_v49 = vor.u32 %v1744_v43, %v1530_v42  ;;  %v1407_v50 = vor.u32 %v1711_v44, %v1404_v45  ;;  %v1410_v52 = vld [vmem:[%s1903_s22 + $0x30] sm:$0xf]  ;;  %v1714_v53 = vld [vmem:[%s1903_s22 + $0x34] sm:$0xf0] }
  0x19   : > { %888 = vmatpush.bf16.msra.mxu1 %v1783_v7  ;;  %1798 = vmatpush.bf16.msra.mxu3 %v1783_v7  ;;  %v1535_v51 = vor.u32 %v1743_v46, %v1532_v47  ;;  %v1538_v54 = vld [vmem:[%s1903_s22 + $0x130] sm:$0xf]  ;;  %v1746_v55 = vld [vmem:[%s1903_s22 + $0x134] sm:$0xf0]  ;;  %v1713_v56 = vld [vmem:[%s1903_s22 + $0x34] sm:$0xf]  ;;  %v1411_v60 = vor.u32 %v1714_v53, %v1410_v52 }
  0x1a   : > { %v1412_v57 = vld [vmem:[%s1903_s22 + $0x38] sm:$0xf0]  ;;  %v1745_v58 = vld [vmem:[%s1903_s22 + $0x134] sm:$0xf]  ;;  %v1539_v61 = vor.u32 %v1746_v55, %v1538_v54  ;;  %v1418_v0 = vld [vmem:[%s1903_s22 + $0x40] sm:$0xf] }
  0x1b   : > { %v1540_v59 = vld [vmem:[%s1903_s22 + $0x138] sm:$0xf0]  ;;  %v1415_v62 = vor.u32 %v1713_v56, %v1412_v57  ;;  %v1716_v1 = vld [vmem:[%s1903_s22 + $0x44] sm:$0xf0]  ;;  %v1546_v2 = vld [vmem:[%s1903_s22 + $0x140] sm:$0xf] }
  0x1c   : > { %720 = vmatpush.bf16.msra.mxu0 %v1774_v8  ;;  %1791 = vmatpush.bf16.msra.mxu2 %v1774_v8  ;;  %v1543_v63 = vor.u32 %v1745_v58, %v1540_v59  ;;  %v1748_v3 = vld [vmem:[%s1903_s22 + $0x144] sm:$0xf0]  ;;  %v1715_v4 = vld [vmem:[%s1903_s22 + $0x44] sm:$0xf]  ;;  %v1420_v5 = vld [vmem:[%s1903_s22 + $0x48] sm:$0xf0]  ;;  %v1419_v8 = vor.u32 %v1716_v1, %v1418_v0 }
  0x1d   : > { %889 = vmatpush.bf16.msra.mxu1 %v1782_v9  ;;  %1799 = vmatpush.bf16.msra.mxu3 %v1782_v9  ;;  %v1747_v6 = vld [vmem:[%s1903_s22 + $0x144] sm:$0xf]  ;;  %v1548_v7 = vld [vmem:[%s1903_s22 + $0x148] sm:$0xf0]  ;;  %v1547_v9 = vor.u32 %v1748_v3, %v1546_v2  ;;  %v1717_v16 = vld [vmem:[%s1903_s22 + $0x54] sm:$0xf] }
  0x1e   : > { %v1428_v17 = vld [vmem:[%s1903_s22 + $0x58] sm:$0xf0]  ;;  %v1749_v18 = vld [vmem:[%s1903_s22 + $0x154] sm:$0xf]  ;;  %v1719_v28 = vld [vmem:[%s1903_s22 + $0x64] sm:$0xf] }
  0x1f   : > { %v1556_v19 = vld [vmem:[%s1903_s22 + $0x158] sm:$0xf0]  ;;  %v1431_v22 = vor.u32 %v1717_v16, %v1428_v17  ;;  %v1436_v29 = vld [vmem:[%s1903_s22 + $0x68] sm:$0xf0]  ;;  %v1751_v30 = vld [vmem:[%s1903_s22 + $0x164] sm:$0xf] }
  0x20   : > { %721 = vmatpush.bf16.msra.mxu0 %v1773_v10  ;;  %1792 = vmatpush.bf16.msra.mxu2 %v1773_v10  ;;  %v1423_v10 = vor.u32 %v1715_v4, %v1420_v5  ;;  %v1559_v23 = vor.u32 %v1749_v18, %v1556_v19  ;;  %v1564_v31 = vld [vmem:[%s1903_s22 + $0x168] sm:$0xf0]  ;;  %v1439_v34 = vor.u32 %v1719_v28, %v1436_v29  ;;  %v1721_v40 = vld [vmem:[%s1903_s22 + $0x74] sm:$0xf]  ;;  %v1444_v41 = vld [vmem:[%s1903_s22 + $0x78] sm:$0xf0] }
  0x21   : > { %890 = vmatpush.bf16.msra.mxu1 %v1781_v11  ;;  %1800 = vmatpush.bf16.msra.mxu3 %v1781_v11  ;;  %v1551_v11 = vor.u32 %v1747_v6, %v1548_v7  ;;  %v1567_v35 = vor.u32 %v1751_v30, %v1564_v31  ;;  %v1753_v42 = vld [vmem:[%s1903_s22 + $0x174] sm:$0xf]  ;;  %v1572_v43 = vld [vmem:[%s1903_s22 + $0x178] sm:$0xf0]  ;;  %v1447_v46 = vor.u32 %v1721_v40, %v1444_v41  ;;  %v1723_v52 = vld [vmem:[%s1903_s22 + $0x84] sm:$0xf] }
  0x22   : > { %v1575_v47 = vor.u32 %v1753_v42, %v1572_v43  ;;  %v1452_v53 = vld [vmem:[%s1903_s22 + $0x88] sm:$0xf0]  ;;  %v1755_v54 = vld [vmem:[%s1903_s22 + $0x184] sm:$0xf]  ;;  %v1989_v59 = vld [vmem:[%s2247_s2] ss:$0 sm:$0xff] }
  0x23   : > { %v1580_v55 = vld [vmem:[%s1903_s22 + $0x188] sm:$0xf0]  ;;  %v1994_v0 = vld [vmem:[%s2248_s3] ss:$0 sm:$0xff]  ;;  %v1758_v16 = vld [vmem:[%s1903_s22 + $0x194] sm:$0xf0] }
  0x24   : > { %722 = vmatpush.bf16.msra.mxu0 %v1772_v12  ;;  %1793 = vmatpush.bf16.msra.mxu2 %v1772_v12  ;;  %v1426_v12 = vld [vmem:[%s1903_s22 + $0x50] sm:$0xf]  ;;  %v1725_v17 = vld [vmem:[%s1903_s22 + $0x94] sm:$0xf]  ;;  %v1460_v18 = vld [vmem:[%s1903_s22 + $0x98] sm:$0xf0] }
  0x25   : > { %891 = vmatpush.bf16.msra.mxu1 %v1780_v13  ;;  %1801 = vmatpush.bf16.msra.mxu3 %v1780_v13  ;;  %v1718_v13 = vld [vmem:[%s1903_s22 + $0x54] sm:$0xf0]  ;;  %v1757_v19 = vld [vmem:[%s1903_s22 + $0x194] sm:$0xf]  ;;  %v1463_v30 = vor.u32 %v1725_v17, %v1460_v18 }
  0x26   : > { %v1427_v20 = vor.u32 %v1718_v13, %v1426_v12  ;;  %v1726_v12 = vld [vmem:[%s1903_s22 + $0x94] sm:$0xf0] }
  0x28   : > { %723 = vmatpush.bf16.msra.mxu0 %v1771_v14  ;;  %1794 = vmatpush.bf16.msra.mxu2 %v1771_v14  ;;  %v1554_v14 = vld [vmem:[%s1903_s22 + $0x150] sm:$0xf] }
  0x29   : > { %892 = vmatpush.bf16.msra.mxu1 %v1779_v15  ;;  %1802 = vmatpush.bf16.msra.mxu3 %v1779_v15  ;;  %v1750_v15 = vld [vmem:[%s1903_s22 + $0x154] sm:$0xf0] }
  0x2a   : > { %v1555_v21 = vor.u32 %v1750_v15, %v1554_v14  ;;  %v1586_v15 = vld [vmem:[%s1903_s22 + $0x190] sm:$0xf] }
  0x2b   : > { %724 = vmatmul.bf16.vlgmr.msra.gmra.mxu0 %v1387_v24  ;;  %804 = vmatmul.bf16.vlgmr.msra.gmra.mxu2 %v1515_v25  ;;  %v1434_v24 = vld [vmem:[%s1903_s22 + $0x60] sm:$0xf]  ;;  %v1720_v25 = vld [vmem:[%s1903_s22 + $0x64] sm:$0xf0] }
  0x2c   : > { %893 = vmatmul.bf16.vlgmr.msra.gmra.mxu1 %v1391_v26  ;;  %973 = vmatmul.bf16.vlgmr.msra.gmra.mxu3 %v1519_v27  ;;  %v1562_v26 = vld [vmem:[%s1903_s22 + $0x160] sm:$0xf]  ;;  %v1752_v27 = vld [vmem:[%s1903_s22 + $0x164] sm:$0xf0]  ;;  %v1435_v32 = vor.u32 %v1720_v25, %v1434_v24 }
  0x2d   : > { %v1563_v33 = vor.u32 %v1752_v27, %v1562_v26  ;;  %v1587_v26 = vor.u32 %v1758_v16, %v1586_v15 }
  0x3b   : > { %729 = vmatmul.bf16.gmra.mxu0 %v1395_v36  ;;  %809 = vmatmul.bf16.gmra.mxu2 %v1523_v37  ;;  %v1442_v36 = vld [vmem:[%s1903_s22 + $0x70] sm:$0xf]  ;;  %v1722_v37 = vld [vmem:[%s1903_s22 + $0x74] sm:$0xf0] }
  0x3c   : > { %898 = vmatmul.bf16.gmra.mxu1 %v1399_v38  ;;  %978 = vmatmul.bf16.gmra.mxu3 %v1527_v39  ;;  %v1570_v38 = vld [vmem:[%s1903_s22 + $0x170] sm:$0xf]  ;;  %v1754_v39 = vld [vmem:[%s1903_s22 + $0x174] sm:$0xf0]  ;;  %v1443_v44 = vor.u32 %v1722_v37, %v1442_v36 }
  0x3d   : > { %v1571_v45 = vor.u32 %v1754_v39, %v1570_v38 }
  0x4b   : > { %734 = vmatmul.bf16.gmra.mxu0 %v1403_v48  ;;  %814 = vmatmul.bf16.gmra.mxu2 %v1531_v49  ;;  %v1450_v48 = vld [vmem:[%s1903_s22 + $0x80] sm:$0xf]  ;;  %v1724_v49 = vld [vmem:[%s1903_s22 + $0x84] sm:$0xf0] }
  0x4c   : > { %903 = vmatmul.bf16.gmra.mxu1 %v1407_v50  ;;  %983 = vmatmul.bf16.gmra.mxu3 %v1535_v51  ;;  %v1578_v50 = vld [vmem:[%s1903_s22 + $0x180] sm:$0xf]  ;;  %v1756_v51 = vld [vmem:[%s1903_s22 + $0x184] sm:$0xf0]  ;;  %v1451_v56 = vor.u32 %v1724_v49, %v1450_v48 }
  0x4d   : > { %v1579_v57 = vor.u32 %v1756_v51, %v1578_v50  ;;  %v1728_v48 = vld [vmem:[%s1903_s22 + $0xa4] sm:$0xf0]  ;;  %v1594_v51 = vld [vmem:[%s1903_s22 + $0x1a0] sm:$0xf] }
  0x5b   : > { %739 = vmatmul.bf16.gmra.mxu0 %v1411_v60  ;;  %819 = vmatmul.bf16.gmra.mxu2 %v1539_v61  ;;  %v1455_v60 = vor.u32 %v1723_v52, %v1452_v53  ;;  %v1583_v61 = vor.u32 %v1755_v54, %v1580_v55  ;;  %v1760_v52 = vld [vmem:[%s1903_s22 + $0x1a4] sm:$0xf0]  ;;  %v1727_v53 = vld [vmem:[%s1903_s22 + $0xa4] sm:$0xf]  ;;  %v1468_v54 = vld [vmem:[%s1903_s22 + $0xa8] sm:$0xf0] }
  0x5c   : > { %908 = vmatmul.bf16.gmra.mxu1 %v1415_v62  ;;  %988 = vmatmul.bf16.gmra.mxu3 %v1543_v63  ;;  %v1759_v55 = vld [vmem:[%s1903_s22 + $0x1a4] sm:$0xf] }
  0x6b   : > { %744 = vmatmul.bf16.gmra.mxu0 %v1419_v8  ;;  %824 = vmatmul.bf16.gmra.mxu2 %v1547_v9 }
  0x6c   : > { %913 = vmatmul.bf16.gmra.mxu1 %v1423_v10  ;;  %993 = vmatmul.bf16.gmra.mxu3 %v1551_v11  ;;  %v1458_v11 = vld [vmem:[%s1903_s22 + $0x90] sm:$0xf] }
  0x6d   : > { %v1459_v25 = vor.u32 %v1726_v12, %v1458_v11 }
  0x7b   : > { %749 = vmatmul.bf16.gmra.mxu0 %v1427_v20  ;;  %829 = vmatmul.bf16.gmra.mxu2 %v1555_v21  ;;  %v1588_v20 = vld [vmem:[%s1903_s22 + $0x198] sm:$0xf0] }
  0x7c   : > { %918 = vmatmul.bf16.gmra.mxu1 %v1431_v22  ;;  %998 = vmatmul.bf16.gmra.mxu3 %v1559_v23  ;;  %v1591_v31 = vor.u32 %v1757_v19, %v1588_v20 }
  0x8b   : > { %754 = vmatmul.bf16.gmra.mxu0 %v1435_v32  ;;  %834 = vmatmul.bf16.gmra.mxu2 %v1563_v33 }
  0x8c   : > { %923 = vmatmul.bf16.gmra.mxu1 %v1439_v34  ;;  %1003 = vmatmul.bf16.gmra.mxu3 %v1567_v35 }
  0x9b   : > { %759 = vmatmul.bf16.gmra.mxu0 %v1443_v44  ;;  %839 = vmatmul.bf16.gmra.mxu2 %v1571_v45 }
  0x9c   : > { %928 = vmatmul.bf16.gmra.mxu1 %v1447_v46  ;;  %1008 = vmatmul.bf16.gmra.mxu3 %v1575_v47  ;;  %v1466_v47 = vld [vmem:[%s1903_s22 + $0xa0] sm:$0xf] }
  0xa8   : > { %v725_v58 = vpop.f32.mrf.mxu0 }
  0xa9   : > { %v894_v62 = vpop.f32.mrf.mxu1 }
  0xaa   : > { %v895_v63 = vadd.f32 %v894_v62, %v725_v58  ;;  %v1467_v62 = vor.u32 %v1728_v48, %v1466_v47 }
  0xab   : > { %764 = vmatmul.bf16.gmra.mxu0 %v1451_v56  ;;  %844 = vmatmul.bf16.gmra.mxu2 %v1579_v57  ;;  %v1596_v56 = vld [vmem:[%s1903_s22 + $0x1a8] sm:$0xf0] }
  0xac   : > { %v1058_v1 = vmul.f32 %v1989_v59, %v895_v63  ;;  %933 = vmatmul.bf16.gmra.mxu1 %v1455_v60  ;;  %1013 = vmatmul.bf16.gmra.mxu3 %v1583_v61  ;;  %v1595_v63 = vor.u32 %v1760_v52, %v1594_v51 }
  0xae   : > { %v1126_v2 = vadd.f32 %v1994_v0, %v1058_v1  ;;  %v805_v3 = vpop.f32.mrf.mxu2 }
  0xaf   : > { %v974_v4 = vpop.f32.mrf.mxu3 }
  0xb0   : > { %v1190_v5 = vmax.f32 %v1126_v2, 0.0  ;;  %v975_v6 = vadd.f32 %v974_v4, %v805_v3  ;;  %v727_v7 = vpop.f32.mrf.mxu0  ;;  %v1471_v4 = vor.u32 %v1727_v53, %v1468_v54 }
  0xb1   : > { %v896_v8 = vpop.f32.mrf.mxu1 }
  0xb2   : > { %1254 = vst [vmem:[%s2003_s10] sm:$0xff] %v1190_v5  ;;  %v1090_v9 = vmul.f32 %v1989_v59, %v975_v6  ;;  %v897_v10 = vadd.f32 %v896_v8, %v727_v7  ;;  %v1599_v5 = vor.u32 %v1759_v55, %v1596_v56 }
  0xb4   : > { %v1158_v13 = vadd.f32 %v1994_v0, %v1090_v9  ;;  %v1059_v14 = vmul.f32 %v1989_v59, %v897_v10 }
  0xb6   : > { %v1222_v21 = vmax.f32 %v1158_v13, 0.0  ;;  %v1127_v22 = vadd.f32 %v1994_v0, %v1059_v14  ;;  %v807_v23 = vpop.f32.mrf.mxu2 }
  0xb7   : > { %v976_v24 = vpop.f32.mrf.mxu3 }
  0xb8   : > { %1286 = vst [vmem:[%s2003_s10 + $0x100] sm:$0xff] %v1222_v21  ;;  %v1191_v27 = vmax.f32 %v1127_v22, 0.0  ;;  %v977_v28 = vadd.f32 %v976_v24, %v807_v23  ;;  %v730_v29 = vpop.f32.mrf.mxu0  ;;  %v1474_v21 = vld [vmem:[%s1903_s22 + $0xb0] sm:$0xf]  ;;  %v1730_v22 = vld [vmem:[%s1903_s22 + $0xb4] sm:$0xf0] }
  0xb9   : > { %v899_v32 = vpop.f32.mrf.mxu1 }
  0xba   : > { %1255 = vst [vmem:[%s2003_s10 + $0x8] sm:$0xff] %v1191_v27  ;;  %v1091_v33 = vmul.f32 %v1989_v59, %v977_v28  ;;  %v900_v34 = vadd.f32 %v899_v32, %v730_v29  ;;  %v1729_v27 = vld [vmem:[%s1903_s22 + $0xb4] sm:$0xf]  ;;  %v1476_v28 = vld [vmem:[%s1903_s22 + $0xb8] sm:$0xf0] }
  0xbb   : > { %769 = vmatmul.bf16.gmra.mxu0 %v1459_v25  ;;  %849 = vmatmul.bf16.gmra.mxu2 %v1587_v26  ;;  %v1602_v25 = vld [vmem:[%s1903_s22 + $0x1b0] sm:$0xf]  ;;  %v1762_v26 = vld [vmem:[%s1903_s22 + $0x1b4] sm:$0xf0]  ;;  %v1761_v29 = vld [vmem:[%s1903_s22 + $0x1b4] sm:$0xf] }
  0xbc   : > { %v1159_v35 = vadd.f32 %v1994_v0, %v1091_v33  ;;  %v1060_v36 = vmul.f32 %v1989_v59, %v900_v34  ;;  %938 = vmatmul.bf16.gmra.mxu1 %v1463_v30  ;;  %1018 = vmatmul.bf16.gmra.mxu3 %v1591_v31  ;;  %v1604_v30 = vld [vmem:[%s1903_s22 + $0x1b8] sm:$0xf0] }
  0xbe   : > { %v1223_v37 = vmax.f32 %v1159_v35, 0.0  ;;  %v1128_v38 = vadd.f32 %v1994_v0, %v1060_v36  ;;  %v810_v39 = vpop.f32.mrf.mxu2  ;;  %v1475_v35 = vor.u32 %v1730_v22, %v1474_v21  ;;  %v1603_v36 = vor.u32 %v1762_v26, %v1602_v25 }
  0xbf   : > { %v979_v40 = vpop.f32.mrf.mxu3 }
  0xc0   : > { %1287 = vst [vmem:[%s2003_s10 + $0x108] sm:$0xff] %v1223_v37  ;;  %v1192_v41 = vmax.f32 %v1128_v38, 0.0  ;;  %v980_v42 = vadd.f32 %v979_v40, %v810_v39  ;;  %v732_v43 = vpop.f32.mrf.mxu0  ;;  %v1479_v40 = vor.u32 %v1729_v27, %v1476_v28 }
  0xc1   : > { %v901_v44 = vpop.f32.mrf.mxu1 }
  0xc2   : > { %1256 = vst [vmem:[%s2003_s10 + $0x10] sm:$0xff] %v1192_v41  ;;  %v1092_v45 = vmul.f32 %v1989_v59, %v980_v42  ;;  %v902_v46 = vadd.f32 %v901_v44, %v732_v43  ;;  %v1607_v41 = vor.u32 %v1761_v29, %v1604_v30 }
  0xc4   : > { %v1160_v49 = vadd.f32 %v1994_v0, %v1092_v45  ;;  %v1061_v50 = vmul.f32 %v1989_v59, %v902_v46 }
  0xc6   : > { %v1224_v57 = vmax.f32 %v1160_v49, 0.0  ;;  %v1129_v58 = vadd.f32 %v1994_v0, %v1061_v50  ;;  %v812_v60 = vpop.f32.mrf.mxu2 }
  0xc7   : > { %v981_v61 = vpop.f32.mrf.mxu3 }
  0xc8   : > { %1288 = vst [vmem:[%s2003_s10 + $0x110] sm:$0xff] %v1224_v57  ;;  %v1193_v1 = vmax.f32 %v1129_v58, 0.0  ;;  %v982_v2 = vadd.f32 %v981_v61, %v812_v60  ;;  %v735_v3 = vpop.f32.mrf.mxu0  ;;  %v1482_v57 = vld [vmem:[%s1903_s22 + $0xc0] sm:$0xf]  ;;  %v1732_v58 = vld [vmem:[%s1903_s22 + $0xc4] sm:$0xf0] }
  0xc9   : > { %v904_v6 = vpop.f32.mrf.mxu1 }
  0xca   : > { %1257 = vst [vmem:[%s2003_s10 + $0x18] sm:$0xff] %v1193_v1  ;;  %v1093_v7 = vmul.f32 %v1989_v59, %v982_v2  ;;  %v905_v8 = vadd.f32 %v904_v6, %v735_v3  ;;  %v1731_v1 = vld [vmem:[%s1903_s22 + $0xc4] sm:$0xf]  ;;  %v1484_v2 = vld [vmem:[%s1903_s22 + $0xc8] sm:$0xf0] }
  0xcb   : > { %774 = vmatmul.bf16.gmra.mxu0 %v1467_v62  ;;  %854 = vmatmul.bf16.gmra.mxu2 %v1595_v63  ;;  %v1610_v62 = vld [vmem:[%s1903_s22 + $0x1c0] sm:$0xf]  ;;  %v1764_v63 = vld [vmem:[%s1903_s22 + $0x1c4] sm:$0xf0]  ;;  %v1763_v3 = vld [vmem:[%s1903_s22 + $0x1c4] sm:$0xf] }
  0xcc   : > { %v1161_v9 = vadd.f32 %v1994_v0, %v1093_v7  ;;  %v1062_v10 = vmul.f32 %v1989_v59, %v905_v8  ;;  %943 = vmatmul.bf16.gmra.mxu1 %v1471_v4  ;;  %1023 = vmatmul.bf16.gmra.mxu3 %v1599_v5  ;;  %v1612_v4 = vld [vmem:[%s1903_s22 + $0x1c8] sm:$0xf0] }
  0xce   : > { %v1225_v11 = vmax.f32 %v1161_v9, 0.0  ;;  %v1130_v12 = vadd.f32 %v1994_v0, %v1062_v10  ;;  %v815_v13 = vpop.f32.mrf.mxu2  ;;  %v1483_v9 = vor.u32 %v1732_v58, %v1482_v57  ;;  %v1611_v10 = vor.u32 %v1764_v63, %v1610_v62 }
  0xcf   : > { %v984_v14 = vpop.f32.mrf.mxu3 }
  0xd0   : > { %1289 = vst [vmem:[%s2003_s10 + $0x118] sm:$0xff] %v1225_v11  ;;  %v1194_v15 = vmax.f32 %v1130_v12, 0.0  ;;  %v985_v16 = vadd.f32 %v984_v14, %v815_v13  ;;  %v737_v17 = vpop.f32.mrf.mxu0  ;;  %v1487_v14 = vor.u32 %v1731_v1, %v1484_v2 }
  0xd1   : > { %v906_v18 = vpop.f32.mrf.mxu1 }
  0xd2   : > { %1258 = vst [vmem:[%s2003_s10 + $0x20] sm:$0xff] %v1194_v15  ;;  %v1094_v19 = vmul.f32 %v1989_v59, %v985_v16  ;;  %v907_v20 = vadd.f32 %v906_v18, %v737_v17  ;;  %v1615_v15 = vor.u32 %v1763_v3, %v1612_v4 }
  0xd4   : > { %v1162_v23 = vadd.f32 %v1994_v0, %v1094_v19  ;;  %v1063_v24 = vmul.f32 %v1989_v59, %v907_v20 }
  0xd6   : > { %v1226_v31 = vmax.f32 %v1162_v23, 0.0  ;;  %v1131_v32 = vadd.f32 %v1994_v0, %v1063_v24  ;;  %v817_v33 = vpop.f32.mrf.mxu2 }
  0xd7   : > { %v986_v34 = vpop.f32.mrf.mxu3 }
  0xd8   : > { %1290 = vst [vmem:[%s2003_s10 + $0x120] sm:$0xff] %v1226_v31  ;;  %v1195_v37 = vmax.f32 %v1131_v32, 0.0  ;;  %v987_v38 = vadd.f32 %v986_v34, %v817_v33  ;;  %v740_v39 = vpop.f32.mrf.mxu0  ;;  %v1490_v31 = vld [vmem:[%s1903_s22 + $0xd0] sm:$0xf]  ;;  %v1734_v32 = vld [vmem:[%s1903_s22 + $0xd4] sm:$0xf0] }
  0xd9   : > { %v909_v42 = vpop.f32.mrf.mxu1 }
  0xda   : > { %1259 = vst [vmem:[%s2003_s10 + $0x28] sm:$0xff] %v1195_v37  ;;  %v1095_v43 = vmul.f32 %v1989_v59, %v987_v38  ;;  %v910_v44 = vadd.f32 %v909_v42, %v740_v39  ;;  %v1733_v37 = vld [vmem:[%s1903_s22 + $0xd4] sm:$0xf]  ;;  %v1492_v38 = vld [vmem:[%s1903_s22 + $0xd8] sm:$0xf0] }
  0xdb   : > { %779 = vmatmul.bf16.gmra.mxu0 %v1475_v35  ;;  %859 = vmatmul.bf16.gmra.mxu2 %v1603_v36  ;;  %v1618_v35 = vld [vmem:[%s1903_s22 + $0x1d0] sm:$0xf]  ;;  %v1766_v36 = vld [vmem:[%s1903_s22 + $0x1d4] sm:$0xf0]  ;;  %v1765_v39 = vld [vmem:[%s1903_s22 + $0x1d4] sm:$0xf] }
  0xdc   : > { %v1163_v45 = vadd.f32 %v1994_v0, %v1095_v43  ;;  %v1064_v46 = vmul.f32 %v1989_v59, %v910_v44  ;;  %948 = vmatmul.bf16.gmra.mxu1 %v1479_v40  ;;  %1028 = vmatmul.bf16.gmra.mxu3 %v1607_v41  ;;  %v1620_v40 = vld [vmem:[%s1903_s22 + $0x1d8] sm:$0xf0] }
  0xde   : > { %v1227_v47 = vmax.f32 %v1163_v45, 0.0  ;;  %v1132_v48 = vadd.f32 %v1994_v0, %v1064_v46  ;;  %v820_v49 = vpop.f32.mrf.mxu2  ;;  %v1491_v45 = vor.u32 %v1734_v32, %v1490_v31  ;;  %v1619_v46 = vor.u32 %v1766_v36, %v1618_v35 }
  0xdf   : > { %v989_v50 = vpop.f32.mrf.mxu3 }
  0xe0   : > { %1291 = vst [vmem:[%s2003_s10 + $0x128] sm:$0xff] %v1227_v47  ;;  %v1196_v51 = vmax.f32 %v1132_v48, 0.0  ;;  %v990_v52 = vadd.f32 %v989_v50, %v820_v49  ;;  %v742_v53 = vpop.f32.mrf.mxu0  ;;  %v1495_v50 = vor.u32 %v1733_v37, %v1492_v38 }
  0xe1   : > { %v911_v54 = vpop.f32.mrf.mxu1 }
  0xe2   : > { %1260 = vst [vmem:[%s2003_s10 + $0x30] sm:$0xff] %v1196_v51  ;;  %v1096_v55 = vmul.f32 %v1989_v59, %v990_v52  ;;  %v912_v56 = vadd.f32 %v911_v54, %v742_v53  ;;  %v1623_v51 = vor.u32 %v1765_v39, %v1620_v40 }
  0xe4   : > { %v1164_v60 = vadd.f32 %v1994_v0, %v1096_v55  ;;  %v1065_v61 = vmul.f32 %v1989_v59, %v912_v56 }
  0xe6   : > { %v1228_v5 = vmax.f32 %v1164_v60, 0.0  ;;  %v1133_v6 = vadd.f32 %v1994_v0, %v1065_v61  ;;  %v822_v7 = vpop.f32.mrf.mxu2 }
  0xe7   : > { %v991_v8 = vpop.f32.mrf.mxu3 }
  0xe8   : > { %1292 = vst [vmem:[%s2003_s10 + $0x130] sm:$0xff] %v1228_v5  ;;  %v1197_v11 = vmax.f32 %v1133_v6, 0.0  ;;  %v992_v12 = vadd.f32 %v991_v8, %v822_v7  ;;  %v745_v13 = vpop.f32.mrf.mxu0  ;;  %v1498_v5 = vld [vmem:[%s1903_s22 + $0xe0] sm:$0xf]  ;;  %v1736_v6 = vld [vmem:[%s1903_s22 + $0xe4] sm:$0xf0] }
  0xe9   : > { %v914_v16 = vpop.f32.mrf.mxu1 }
  0xea   : > { %1261 = vst [vmem:[%s2003_s10 + $0x38] sm:$0xff] %v1197_v11  ;;  %v1097_v17 = vmul.f32 %v1989_v59, %v992_v12  ;;  %v915_v18 = vadd.f32 %v914_v16, %v745_v13  ;;  %v1735_v11 = vld [vmem:[%s1903_s22 + $0xe4] sm:$0xf]  ;;  %v1500_v12 = vld [vmem:[%s1903_s22 + $0xe8] sm:$0xf0] }
  0xeb   : > { %784 = vmatmul.bf16.gmra.mxu0 %v1483_v9  ;;  %864 = vmatmul.bf16.gmra.mxu2 %v1611_v10  ;;  %v1626_v9 = vld [vmem:[%s1903_s22 + $0x1e0] sm:$0xf]  ;;  %v1768_v10 = vld [vmem:[%s1903_s22 + $0x1e4] sm:$0xf0]  ;;  %v1767_v13 = vld [vmem:[%s1903_s22 + $0x1e4] sm:$0xf] }
  0xec   : > { %v1165_v19 = vadd.f32 %v1994_v0, %v1097_v17  ;;  %v1066_v20 = vmul.f32 %v1989_v59, %v915_v18  ;;  %953 = vmatmul.bf16.gmra.mxu1 %v1487_v14  ;;  %1033 = vmatmul.bf16.gmra.mxu3 %v1615_v15  ;;  %v1628_v14 = vld [vmem:[%s1903_s22 + $0x1e8] sm:$0xf0] }
  0xee   : > { %v1229_v21 = vmax.f32 %v1165_v19, 0.0  ;;  %v1134_v22 = vadd.f32 %v1994_v0, %v1066_v20  ;;  %v825_v23 = vpop.f32.mrf.mxu2  ;;  %v1499_v19 = vor.u32 %v1736_v6, %v1498_v5  ;;  %v1627_v20 = vor.u32 %v1768_v10, %v1626_v9 }
  0xef   : > { %v994_v24 = vpop.f32.mrf.mxu3 }
  0xf0   : > { %1293 = vst [vmem:[%s2003_s10 + $0x138] sm:$0xff] %v1229_v21  ;;  %v1198_v25 = vmax.f32 %v1134_v22, 0.0  ;;  %v995_v26 = vadd.f32 %v994_v24, %v825_v23  ;;  %v747_v27 = vpop.f32.mrf.mxu0  ;;  %v1503_v24 = vor.u32 %v1735_v11, %v1500_v12 }
  0xf1   : > { %v916_v28 = vpop.f32.mrf.mxu1 }
  0xf2   : > { %1262 = vst [vmem:[%s2003_s10 + $0x40] sm:$0xff] %v1198_v25  ;;  %v1098_v29 = vmul.f32 %v1989_v59, %v995_v26  ;;  %v917_v30 = vadd.f32 %v916_v28, %v747_v27  ;;  %v1631_v25 = vor.u32 %v1767_v13, %v1628_v14 }
  0xf4   : > { %v1166_v33 = vadd.f32 %v1994_v0, %v1098_v29  ;;  %v1067_v34 = vmul.f32 %v1989_v59, %v917_v30 }
  0xf6   : > { %v1230_v41 = vmax.f32 %v1166_v33, 0.0  ;;  %v1135_v42 = vadd.f32 %v1994_v0, %v1067_v34  ;;  %v827_v43 = vpop.f32.mrf.mxu2 }
  0xf7   : > { %v996_v44 = vpop.f32.mrf.mxu3 }
  0xf8   : > { %1294 = vst [vmem:[%s2003_s10 + $0x140] sm:$0xff] %v1230_v41  ;;  %v1199_v47 = vmax.f32 %v1135_v42, 0.0  ;;  %v997_v48 = vadd.f32 %v996_v44, %v827_v43  ;;  %v750_v49 = vpop.f32.mrf.mxu0  ;;  %v1506_v41 = vld [vmem:[%s1903_s22 + $0xf0] sm:$0xf]  ;;  %v1738_v42 = vld [vmem:[%s1903_s22 + $0xf4] sm:$0xf0] }
  0xf9   : > { %v919_v52 = vpop.f32.mrf.mxu1 }
  0xfa   : > { %1263 = vst [vmem:[%s2003_s10 + $0x48] sm:$0xff] %v1199_v47  ;;  %v1099_v53 = vmul.f32 %v1989_v59, %v997_v48  ;;  %v920_v54 = vadd.f32 %v919_v52, %v750_v49  ;;  %v1737_v47 = vld [vmem:[%s1903_s22 + $0xf4] sm:$0xf]  ;;  %v1508_v48 = vld [vmem:[%s1903_s22 + $0xf8] sm:$0xf0] }
  0xfb   : > { %789 = vmatmul.bf16.gmra.mxu0 %v1491_v45  ;;  %869 = vmatmul.bf16.gmra.mxu2 %v1619_v46  ;;  %v1634_v45 = vld [vmem:[%s1903_s22 + $0x1f0] sm:$0xf]  ;;  %v1770_v46 = vld [vmem:[%s1903_s22 + $0x1f4] sm:$0xf0]  ;;  %v1769_v49 = vld [vmem:[%s1903_s22 + $0x1f4] sm:$0xf] }
  0xfc   : > { %v1167_v55 = vadd.f32 %v1994_v0, %v1099_v53  ;;  %v1068_v56 = vmul.f32 %v1989_v59, %v920_v54  ;;  %958 = vmatmul.bf16.gmra.mxu1 %v1495_v50  ;;  %1038 = vmatmul.bf16.gmra.mxu3 %v1623_v51  ;;  %v1636_v50 = vld [vmem:[%s1903_s22 + $0x1f8] sm:$0xf0] }
  0xfe   : > { %v1231_v57 = vmax.f32 %v1167_v55, 0.0  ;;  %v1136_v58 = vadd.f32 %v1994_v0, %v1068_v56  ;;  %v830_v60 = vpop.f32.mrf.mxu2  ;;  %v1507_v55 = vor.u32 %v1738_v42, %v1506_v41  ;;  %v1635_v56 = vor.u32 %v1770_v46, %v1634_v45 }
  0xff   : > { %v999_v61 = vpop.f32.mrf.mxu3 }
 0x100   : > { %1295 = vst [vmem:[%s2003_s10 + $0x148] sm:$0xff] %v1231_v57  ;;  %v1200_v62 = vmax.f32 %v1136_v58, 0.0  ;;  %v1000_v63 = vadd.f32 %v999_v61, %v830_v60  ;;  %v752_v1 = vpop.f32.mrf.mxu0  ;;  %v1511_v61 = vor.u32 %v1737_v47, %v1508_v48 }
 0x101   : > { %v921_v2 = vpop.f32.mrf.mxu1 }
 0x102   : > { %1264 = vst [vmem:[%s2003_s10 + $0x50] sm:$0xff] %v1200_v62  ;;  %v1100_v3 = vmul.f32 %v1989_v59, %v1000_v63  ;;  %v922_v4 = vadd.f32 %v921_v2, %v752_v1  ;;  %v1639_v62 = vor.u32 %v1769_v49, %v1636_v50 }
 0x104   : > { %v1168_v7 = vadd.f32 %v1994_v0, %v1100_v3  ;;  %v1069_v8 = vmul.f32 %v1989_v59, %v922_v4 }
 0x106   : > { %v1232_v15 = vmax.f32 %v1168_v7, 0.0  ;;  %v1137_v16 = vadd.f32 %v1994_v0, %v1069_v8  ;;  %v832_v17 = vpop.f32.mrf.mxu2 }
 0x107   : > { %v1001_v18 = vpop.f32.mrf.mxu3 }
 0x108   : > { %1296 = vst [vmem:[%s2003_s10 + $0x150] sm:$0xff] %v1232_v15  ;;  %v1201_v21 = vmax.f32 %v1137_v16, 0.0  ;;  %v1002_v22 = vadd.f32 %v1001_v18, %v832_v17  ;;  %v755_v23 = vpop.f32.mrf.mxu0 }
 0x109   : > { %v924_v26 = vpop.f32.mrf.mxu1 }
 0x10a   : > { %1265 = vst [vmem:[%s2003_s10 + $0x58] sm:$0xff] %v1201_v21  ;;  %v1101_v27 = vmul.f32 %v1989_v59, %v1002_v22  ;;  %v925_v28 = vadd.f32 %v924_v26, %v755_v23 }
 0x10b   : > { %794 = vmatmul.bf16.gmra.mxu0 %v1499_v19  ;;  %874 = vmatmul.bf16.gmra.mxu2 %v1627_v20 }
 0x10c   : > { %v1169_v29 = vadd.f32 %v1994_v0, %v1101_v27  ;;  %v1070_v30 = vmul.f32 %v1989_v59, %v925_v28  ;;  %963 = vmatmul.bf16.gmra.mxu1 %v1503_v24  ;;  %1043 = vmatmul.bf16.gmra.mxu3 %v1631_v25 }
 0x10e   : > { %v1233_v31 = vmax.f32 %v1169_v29, 0.0  ;;  %v1138_v32 = vadd.f32 %v1994_v0, %v1070_v30  ;;  %v835_v33 = vpop.f32.mrf.mxu2 }
 0x10f   : > { %v1004_v34 = vpop.f32.mrf.mxu3 }
 0x110   : > { %1297 = vst [vmem:[%s2003_s10 + $0x158] sm:$0xff] %v1233_v31  ;;  %v1202_v35 = vmax.f32 %v1138_v32, 0.0  ;;  %v1005_v36 = vadd.f32 %v1004_v34, %v835_v33  ;;  %v757_v37 = vpop.f32.mrf.mxu0 }
 0x111   : > { %v926_v38 = vpop.f32.mrf.mxu1 }
 0x112   : > { %1266 = vst [vmem:[%s2003_s10 + $0x60] sm:$0xff] %v1202_v35  ;;  %v1102_v39 = vmul.f32 %v1989_v59, %v1005_v36  ;;  %v927_v40 = vadd.f32 %v926_v38, %v757_v37 }
 0x114   : > { %v1170_v43 = vadd.f32 %v1994_v0, %v1102_v39  ;;  %v1071_v44 = vmul.f32 %v1989_v59, %v927_v40 }
 0x116   : > { %v1234_v51 = vmax.f32 %v1170_v43, 0.0  ;;  %v1139_v52 = vadd.f32 %v1994_v0, %v1071_v44  ;;  %v837_v53 = vpop.f32.mrf.mxu2 }
 0x117   : > { %v1006_v54 = vpop.f32.mrf.mxu3 }
 0x118   : > { %1298 = vst [vmem:[%s2003_s10 + $0x160] sm:$0xff] %v1234_v51  ;;  %v1203_v57 = vmax.f32 %v1139_v52, 0.0  ;;  %v1007_v58 = vadd.f32 %v1006_v54, %v837_v53  ;;  %v760_v60 = vpop.f32.mrf.mxu0 }
 0x119   : > { %v929_v63 = vpop.f32.mrf.mxu1 }
 0x11a   : > { %1267 = vst [vmem:[%s2003_s10 + $0x68] sm:$0xff] %v1203_v57  ;;  %v1103_v1 = vmul.f32 %v1989_v59, %v1007_v58  ;;  %v930_v2 = vadd.f32 %v929_v63, %v760_v60 }
 0x11b   : > { %799 = vmatmul.bf16.gmra.mxu0 %v1507_v55  ;;  %879 = vmatmul.bf16.gmra.mxu2 %v1635_v56 }
 0x11c   : > { %v1171_v3 = vadd.f32 %v1994_v0, %v1103_v1  ;;  %v1072_v4 = vmul.f32 %v1989_v59, %v930_v2  ;;  %968 = vmatmul.bf16.gmra.mxu1 %v1511_v61  ;;  %1048 = vmatmul.bf16.gmra.mxu3 %v1639_v62 }
 0x11e   : > { %v1235_v5 = vmax.f32 %v1171_v3, 0.0  ;;  %v1140_v6 = vadd.f32 %v1994_v0, %v1072_v4  ;;  %v840_v7 = vpop.f32.mrf.mxu2 }
 0x11f   : > { %v1009_v8 = vpop.f32.mrf.mxu3 }
 0x120   : > { %1299 = vst [vmem:[%s2003_s10 + $0x168] sm:$0xff] %v1235_v5  ;;  %v1204_v9 = vmax.f32 %v1140_v6, 0.0  ;;  %v1010_v10 = vadd.f32 %v1009_v8, %v840_v7  ;;  %v762_v11 = vpop.f32.mrf.mxu0 }
 0x121   : > { %v931_v12 = vpop.f32.mrf.mxu1 }
 0x122   : > { %1268 = vst [vmem:[%s2003_s10 + $0x70] sm:$0xff] %v1204_v9  ;;  %v1104_v13 = vmul.f32 %v1989_v59, %v1010_v10  ;;  %v932_v14 = vadd.f32 %v931_v12, %v762_v11 }
 0x124   : > { %v1172_v15 = vadd.f32 %v1994_v0, %v1104_v13  ;;  %v1073_v16 = vmul.f32 %v1989_v59, %v932_v14 }
 0x126   : > { %v1236_v17 = vmax.f32 %v1172_v15, 0.0  ;;  %v1141_v18 = vadd.f32 %v1994_v0, %v1073_v16  ;;  %v842_v19 = vpop.f32.mrf.mxu2 }
 0x127   : > { %v1011_v20 = vpop.f32.mrf.mxu3 }
 0x128   : > { %1300 = vst [vmem:[%s2003_s10 + $0x170] sm:$0xff] %v1236_v17  ;;  %v1205_v21 = vmax.f32 %v1141_v18, 0.0  ;;  %v1012_v22 = vadd.f32 %v1011_v20, %v842_v19  ;;  %v765_v23 = vpop.f32.mrf.mxu0 }
 0x129   : > { %v934_v24 = vpop.f32.mrf.mxu1 }
 0x12a   : > { %1269 = vst [vmem:[%s2003_s10 + $0x78] sm:$0xff] %v1205_v21  ;;  %v1105_v25 = vmul.f32 %v1989_v59, %v1012_v22  ;;  %v935_v26 = vadd.f32 %v934_v24, %v765_v23 }
 0x12c   : > { %v1173_v27 = vadd.f32 %v1994_v0, %v1105_v25  ;;  %v1074_v28 = vmul.f32 %v1989_v59, %v935_v26 }
 0x12e   : > { %v1237_v29 = vmax.f32 %v1173_v27, 0.0  ;;  %v1142_v30 = vadd.f32 %v1994_v0, %v1074_v28  ;;  %v845_v31 = vpop.f32.mrf.mxu2 }
 0x12f   : > { %v1014_v32 = vpop.f32.mrf.mxu3 }
 0x130   : > { %1301 = vst [vmem:[%s2003_s10 + $0x178] sm:$0xff] %v1237_v29  ;;  %v1206_v33 = vmax.f32 %v1142_v30, 0.0  ;;  %v1015_v34 = vadd.f32 %v1014_v32, %v845_v31  ;;  %v767_v35 = vpop.f32.mrf.mxu0 }
 0x131   : > { %v936_v36 = vpop.f32.mrf.mxu1 }
 0x132   : > { %1270 = vst [vmem:[%s2003_s10 + $0x80] sm:$0xff] %v1206_v33  ;;  %v1106_v37 = vmul.f32 %v1989_v59, %v1015_v34  ;;  %v937_v38 = vadd.f32 %v936_v36, %v767_v35 }
 0x134   : > { %v1174_v39 = vadd.f32 %v1994_v0, %v1106_v37  ;;  %v1075_v40 = vmul.f32 %v1989_v59, %v937_v38 }
 0x136   : > { %v1238_v41 = vmax.f32 %v1174_v39, 0.0  ;;  %v1143_v42 = vadd.f32 %v1994_v0, %v1075_v40  ;;  %v847_v43 = vpop.f32.mrf.mxu2 }
 0x137   : > { %v1016_v44 = vpop.f32.mrf.mxu3 }
 0x138   : > { %1302 = vst [vmem:[%s2003_s10 + $0x180] sm:$0xff] %v1238_v41  ;;  %v1207_v45 = vmax.f32 %v1143_v42, 0.0  ;;  %v1017_v46 = vadd.f32 %v1016_v44, %v847_v43  ;;  %v770_v47 = vpop.f32.mrf.mxu0 }
 0x139   : > { %v939_v48 = vpop.f32.mrf.mxu1 }
 0x13a   : > { %1271 = vst [vmem:[%s2003_s10 + $0x88] sm:$0xff] %v1207_v45  ;;  %v1107_v49 = vmul.f32 %v1989_v59, %v1017_v46  ;;  %v940_v50 = vadd.f32 %v939_v48, %v770_v47 }
 0x13c   : > { %v1175_v51 = vadd.f32 %v1994_v0, %v1107_v49  ;;  %v1076_v52 = vmul.f32 %v1989_v59, %v940_v50 }
 0x13e   : > { %v1239_v53 = vmax.f32 %v1175_v51, 0.0  ;;  %v1144_v54 = vadd.f32 %v1994_v0, %v1076_v52  ;;  %v850_v55 = vpop.f32.mrf.mxu2 }
 0x13f   : > { %v1019_v56 = vpop.f32.mrf.mxu3 }
 0x140   : > { %1303 = vst [vmem:[%s2003_s10 + $0x188] sm:$0xff] %v1239_v53  ;;  %v1208_v57 = vmax.f32 %v1144_v54, 0.0  ;;  %v1020_v58 = vadd.f32 %v1019_v56, %v850_v55  ;;  %v772_v60 = vpop.f32.mrf.mxu0 }
 0x141   : > { %v941_v61 = vpop.f32.mrf.mxu1 }
 0x142   : > { %1272 = vst [vmem:[%s2003_s10 + $0x90] sm:$0xff] %v1208_v57  ;;  %v1108_v62 = vmul.f32 %v1989_v59, %v1020_v58  ;;  %v942_v63 = vadd.f32 %v941_v61, %v772_v60 }
 0x144   : > { %v1176_v1 = vadd.f32 %v1994_v0, %v1108_v62  ;;  %v1077_v2 = vmul.f32 %v1989_v59, %v942_v63 }
 0x146   : > { %v1240_v3 = vmax.f32 %v1176_v1, 0.0  ;;  %v1145_v4 = vadd.f32 %v1994_v0, %v1077_v2  ;;  %v852_v5 = vpop.f32.mrf.mxu2 }
 0x147   : > { %v1021_v6 = vpop.f32.mrf.mxu3 }
 0x148   : > { %1304 = vst [vmem:[%s2003_s10 + $0x190] sm:$0xff] %v1240_v3  ;;  %v1209_v7 = vmax.f32 %v1145_v4, 0.0  ;;  %v1022_v8 = vadd.f32 %v1021_v6, %v852_v5  ;;  %v775_v9 = vpop.f32.mrf.mxu0 }
 0x149   : > { %v944_v10 = vpop.f32.mrf.mxu1 }
 0x14a   : > { %1273 = vst [vmem:[%s2003_s10 + $0x98] sm:$0xff] %v1209_v7  ;;  %v1109_v11 = vmul.f32 %v1989_v59, %v1022_v8  ;;  %v945_v12 = vadd.f32 %v944_v10, %v775_v9 }
 0x14c   : > { %v1177_v13 = vadd.f32 %v1994_v0, %v1109_v11  ;;  %v1078_v14 = vmul.f32 %v1989_v59, %v945_v12 }
 0x14e   : > { %v1241_v15 = vmax.f32 %v1177_v13, 0.0  ;;  %v1146_v16 = vadd.f32 %v1994_v0, %v1078_v14  ;;  %v855_v17 = vpop.f32.mrf.mxu2 }
 0x14f   : > { %v1024_v18 = vpop.f32.mrf.mxu3 }
 0x150   : > { %1305 = vst [vmem:[%s2003_s10 + $0x198] sm:$0xff] %v1241_v15  ;;  %v1210_v19 = vmax.f32 %v1146_v16, 0.0  ;;  %v1025_v20 = vadd.f32 %v1024_v18, %v855_v17  ;;  %v777_v21 = vpop.f32.mrf.mxu0 }
 0x151   : > { %v946_v22 = vpop.f32.mrf.mxu1 }
 0x152   : > { %1274 = vst [vmem:[%s2003_s10 + $0xa0] sm:$0xff] %v1210_v19  ;;  %v1110_v23 = vmul.f32 %v1989_v59, %v1025_v20  ;;  %v947_v24 = vadd.f32 %v946_v22, %v777_v21 }
 0x154   : > { %v1178_v25 = vadd.f32 %v1994_v0, %v1110_v23  ;;  %v1079_v26 = vmul.f32 %v1989_v59, %v947_v24 }
 0x156   : > { %v1242_v27 = vmax.f32 %v1178_v25, 0.0  ;;  %v1147_v28 = vadd.f32 %v1994_v0, %v1079_v26  ;;  %v857_v29 = vpop.f32.mrf.mxu2 }
 0x157   : > { %v1026_v30 = vpop.f32.mrf.mxu3 }
 0x158   : > { %1306 = vst [vmem:[%s2003_s10 + $0x1a0] sm:$0xff] %v1242_v27  ;;  %v1211_v31 = vmax.f32 %v1147_v28, 0.0  ;;  %v1027_v32 = vadd.f32 %v1026_v30, %v857_v29  ;;  %v780_v33 = vpop.f32.mrf.mxu0 }
 0x159   : > { %v949_v34 = vpop.f32.mrf.mxu1 }
 0x15a   : > { %1275 = vst [vmem:[%s2003_s10 + $0xa8] sm:$0xff] %v1211_v31  ;;  %v1111_v35 = vmul.f32 %v1989_v59, %v1027_v32  ;;  %v950_v36 = vadd.f32 %v949_v34, %v780_v33 }
 0x15c   : > { %v1179_v37 = vadd.f32 %v1994_v0, %v1111_v35  ;;  %v1080_v38 = vmul.f32 %v1989_v59, %v950_v36 }
 0x15e   : > { %v1243_v39 = vmax.f32 %v1179_v37, 0.0  ;;  %v1148_v40 = vadd.f32 %v1994_v0, %v1080_v38  ;;  %v860_v41 = vpop.f32.mrf.mxu2 }
 0x15f   : > { %v1029_v42 = vpop.f32.mrf.mxu3 }
 0x160   : > { %1307 = vst [vmem:[%s2003_s10 + $0x1a8] sm:$0xff] %v1243_v39  ;;  %v1212_v43 = vmax.f32 %v1148_v40, 0.0  ;;  %v1030_v44 = vadd.f32 %v1029_v42, %v860_v41  ;;  %v782_v45 = vpop.f32.mrf.mxu0 }
 0x161   : > { %v951_v46 = vpop.f32.mrf.mxu1 }
 0x162   : > { %1276 = vst [vmem:[%s2003_s10 + $0xb0] sm:$0xff] %v1212_v43  ;;  %v1112_v47 = vmul.f32 %v1989_v59, %v1030_v44  ;;  %v952_v48 = vadd.f32 %v951_v46, %v782_v45 }
 0x164   : > { %v1180_v49 = vadd.f32 %v1994_v0, %v1112_v47  ;;  %v1081_v50 = vmul.f32 %v1989_v59, %v952_v48  ;;  %v1813_v48 = vld [vmem:[%s2247_s2] ss:$0 sm:$0xff] }
 0x166   : > { %v1244_v51 = vmax.f32 %v1180_v49, 0.0  ;;  %v1149_v52 = vadd.f32 %v1994_v0, %v1081_v50  ;;  %v862_v53 = vpop.f32.mrf.mxu2 }
 0x167   : > { %v1031_v54 = vpop.f32.mrf.mxu3 }
 0x168   : > { %1308 = vst [vmem:[%s2003_s10 + $0x1b0] sm:$0xff] %v1244_v51  ;;  %v1213_v55 = vmax.f32 %v1149_v52, 0.0  ;;  %v1032_v56 = vadd.f32 %v1031_v54, %v862_v53  ;;  %v785_v57 = vpop.f32.mrf.mxu0 }
 0x169   : > { %v954_v58 = vpop.f32.mrf.mxu1 }
 0x16a   : > { %1277 = vst [vmem:[%s2003_s10 + $0xb8] sm:$0xff] %v1213_v55  ;;  %v1113_v60 = vmul.f32 %v1989_v59, %v1032_v56  ;;  %v955_v61 = vadd.f32 %v954_v58, %v785_v57 }
 0x16c   : > { %v1181_v62 = vadd.f32 %v1994_v0, %v1113_v60  ;;  %v1082_v63 = vmul.f32 %v1989_v59, %v955_v61  ;;  %v1814_v60 = vld [vmem:[%s2248_s3] ss:$0 sm:$0xff] }
 0x16e   : > { %v1245_v1 = vmax.f32 %v1181_v62, 0.0  ;;  %v1150_v2 = vadd.f32 %v1994_v0, %v1082_v63  ;;  %v865_v3 = vpop.f32.mrf.mxu2 }
 0x16f   : > { %v1034_v4 = vpop.f32.mrf.mxu3 }
 0x170   : > { %1309 = vst [vmem:[%s2003_s10 + $0x1b8] sm:$0xff] %v1245_v1  ;;  %v1214_v5 = vmax.f32 %v1150_v2, 0.0  ;;  %v1035_v6 = vadd.f32 %v1034_v4, %v865_v3  ;;  %v787_v7 = vpop.f32.mrf.mxu0 }
 0x171   : > { %v956_v8 = vpop.f32.mrf.mxu1 }
 0x172   : > { %1278 = vst [vmem:[%s2003_s10 + $0xc0] sm:$0xff] %v1214_v5  ;;  %v1114_v9 = vmul.f32 %v1989_v59, %v1035_v6  ;;  %v957_v10 = vadd.f32 %v956_v8, %v787_v7 }
 0x174   : > { %v1182_v11 = vadd.f32 %v1994_v0, %v1114_v9  ;;  %v1083_v12 = vmul.f32 %v1989_v59, %v957_v10 }
 0x176   : > { %v1246_v13 = vmax.f32 %v1182_v11, 0.0  ;;  %v1151_v14 = vadd.f32 %v1994_v0, %v1083_v12  ;;  %v867_v15 = vpop.f32.mrf.mxu2 }
 0x177   : > { %v1036_v16 = vpop.f32.mrf.mxu3 }
 0x178   : > { %1310 = vst [vmem:[%s2003_s10 + $0x1c0] sm:$0xff] %v1246_v13  ;;  %v1215_v17 = vmax.f32 %v1151_v14, 0.0  ;;  %v1037_v18 = vadd.f32 %v1036_v16, %v867_v15  ;;  %v790_v19 = vpop.f32.mrf.mxu0 }
 0x179   : > { %v959_v20 = vpop.f32.mrf.mxu1 }
 0x17a   : > { %1279 = vst [vmem:[%s2003_s10 + $0xc8] sm:$0xff] %v1215_v17  ;;  %v1115_v21 = vmul.f32 %v1989_v59, %v1037_v18  ;;  %v960_v22 = vadd.f32 %v959_v20, %v790_v19 }
 0x17c   : > { %v1183_v23 = vadd.f32 %v1994_v0, %v1115_v21  ;;  %v1084_v24 = vmul.f32 %v1989_v59, %v960_v22 }
 0x17e   : > { %v1247_v25 = vmax.f32 %v1183_v23, 0.0  ;;  %v1152_v26 = vadd.f32 %v1994_v0, %v1084_v24  ;;  %v870_v27 = vpop.f32.mrf.mxu2 }
 0x17f   : > { %v1039_v28 = vpop.f32.mrf.mxu3 }
 0x180   : > { %1311 = vst [vmem:[%s2003_s10 + $0x1c8] sm:$0xff] %v1247_v25  ;;  %v1216_v29 = vmax.f32 %v1152_v26, 0.0  ;;  %v1040_v30 = vadd.f32 %v1039_v28, %v870_v27  ;;  %v792_v31 = vpop.f32.mrf.mxu0 }
 0x181   : > { %v961_v32 = vpop.f32.mrf.mxu1 }
 0x182   : > { %1280 = vst [vmem:[%s2003_s10 + $0xd0] sm:$0xff] %v1216_v29  ;;  %v1116_v33 = vmul.f32 %v1989_v59, %v1040_v30  ;;  %v962_v34 = vadd.f32 %v961_v32, %v792_v31 }
 0x184   : > { %v1184_v35 = vadd.f32 %v1994_v0, %v1116_v33  ;;  %v1085_v36 = vmul.f32 %v1989_v59, %v962_v34 }
 0x186   : > { %v1248_v37 = vmax.f32 %v1184_v35, 0.0  ;;  %v1153_v38 = vadd.f32 %v1994_v0, %v1085_v36  ;;  %v872_v39 = vpop.f32.mrf.mxu2 }
 0x187   : > { %v1041_v40 = vpop.f32.mrf.mxu3 }
 0x188   : > { %1312 = vst [vmem:[%s2003_s10 + $0x1d0] sm:$0xff] %v1248_v37  ;;  %v1217_v41 = vmax.f32 %v1153_v38, 0.0  ;;  %v1042_v42 = vadd.f32 %v1041_v40, %v872_v39  ;;  %v795_v43 = vpop.f32.mrf.mxu0 }
 0x189   : > { %v964_v44 = vpop.f32.mrf.mxu1 }
 0x18a   : > { %1281 = vst [vmem:[%s2003_s10 + $0xd8] sm:$0xff] %v1217_v41  ;;  %v1117_v45 = vmul.f32 %v1989_v59, %v1042_v42  ;;  %v965_v46 = vadd.f32 %v964_v44, %v795_v43 }
 0x18c   : > { %v1185_v47 = vadd.f32 %v1994_v0, %v1117_v45  ;;  %v1086_v49 = vmul.f32 %v1813_v48, %v965_v46 }
 0x18e   : > { %v1249_v50 = vmax.f32 %v1185_v47, 0.0  ;;  %v1154_v51 = vadd.f32 %v1994_v0, %v1086_v49  ;;  %v875_v52 = vpop.f32.mrf.mxu2 }
 0x18f   : > { %v1044_v53 = vpop.f32.mrf.mxu3 }
 0x190   : > { %1313 = vst [vmem:[%s2003_s10 + $0x1d8] sm:$0xff] %v1249_v50  ;;  %v1218_v54 = vmax.f32 %v1154_v51, 0.0  ;;  %v1045_v55 = vadd.f32 %v1044_v53, %v875_v52  ;;  %v797_v56 = vpop.f32.mrf.mxu0 }
 0x191   : > { %v966_v57 = vpop.f32.mrf.mxu1 }
 0x192   : > { %1282 = vst [vmem:[%s2003_s10 + $0xe0] sm:$0xff] %v1218_v54  ;;  %v1118_v59 = vmul.f32 %v1813_v48, %v1045_v55  ;;  %v967_v58 = vadd.f32 %v966_v57, %v797_v56 }
 0x194   : > { %v1186_v61 = vadd.f32 %v1814_v60, %v1118_v59  ;;  %v1087_v62 = vmul.f32 %v1813_v48, %v967_v58 }
 0x196   : > { %v1250_v63 = vmax.f32 %v1186_v61, 0.0  ;;  %v1155_v0 = vadd.f32 %v1814_v60, %v1087_v62  ;;  %v877_v1 = vpop.f32.mrf.mxu2 }
 0x197   : > { %v1046_v2 = vpop.f32.mrf.mxu3 }
 0x198   : > { %1314 = vst [vmem:[%s2003_s10 + $0x1e0] sm:$0xff] %v1250_v63  ;;  %v1219_v3 = vmax.f32 %v1155_v0, 0.0  ;;  %v1047_v4 = vadd.f32 %v1046_v2, %v877_v1  ;;  %v800_v5 = vpop.f32.mrf.mxu0 }
 0x199   : > { %v969_v6 = vpop.f32.mrf.mxu1 }
 0x19a   : > { %1283 = vst [vmem:[%s2003_s10 + $0xe8] sm:$0xff] %v1219_v3  ;;  %v1119_v7 = vmul.f32 %v1813_v48, %v1047_v4  ;;  %v970_v8 = vadd.f32 %v969_v6, %v800_v5 }
 0x19c   : > { %v1187_v9 = vadd.f32 %v1814_v60, %v1119_v7  ;;  %v1088_v10 = vmul.f32 %v1813_v48, %v970_v8 }
 0x19e   : > { %v1251_v11 = vmax.f32 %v1187_v9, 0.0  ;;  %v1156_v12 = vadd.f32 %v1814_v60, %v1088_v10  ;;  %v880_v13 = vpop.f32.mrf.mxu2 }
 0x19f   : > { %v1049_v14 = vpop.f32.mrf.mxu3 }
 0x1a0   : > { %1315 = vst [vmem:[%s2003_s10 + $0x1e8] sm:$0xff] %v1251_v11  ;;  %v1220_v15 = vmax.f32 %v1156_v12, 0.0  ;;  %v1050_v16 = vadd.f32 %v1049_v14, %v880_v13  ;;  %v802_v17 = vpop.f32.mrf.mxu0 }
 0x1a1   : > { %v971_v18 = vpop.f32.mrf.mxu1 }
 0x1a2   : > { %1284 = vst [vmem:[%s2003_s10 + $0xf0] sm:$0xff] %v1220_v15  ;;  %v1120_v19 = vmul.f32 %v1813_v48, %v1050_v16  ;;  %v972_v20 = vadd.f32 %v971_v18, %v802_v17 }
 0x1a4   : > { %v1188_v21 = vadd.f32 %v1814_v60, %v1120_v19  ;;  %v1089_v22 = vmul.f32 %v1813_v48, %v972_v20 }
 0x1a6   : > { %v1252_v23 = vmax.f32 %v1188_v21, 0.0  ;;  %v1157_v24 = vadd.f32 %v1814_v60, %v1089_v22  ;;  %v882_v25 = vpop.f32.mrf.mxu2 }
 0x1a7   : > { %v1051_v26 = vpop.f32.mrf.mxu3 }
 0x1a8   : > { %1316 = vst [vmem:[%s2003_s10 + $0x1f0] sm:$0xff] %v1252_v23  ;;  %v1221_v27 = vmax.f32 %v1157_v24, 0.0  ;;  %v1052_v28 = vadd.f32 %v1051_v26, %v882_v25 }
 0x1aa   : > { %1285 = vst [vmem:[%s2003_s10 + $0xf8] sm:$0xff] %v1221_v27  ;;  %v1121_v29 = vmul.f32 %v1813_v48, %v1052_v28 }
 0x1ac   : > { %v1189_v30 = vadd.f32 %v1814_v60, %v1121_v29 }
 0x1ae   : > { %v1253_v31 = vmax.f32 %v1189_v30, 0.0 }
 0x1b0   : > { %1317 = vst [vmem:[%s2003_s10 + $0x1f8] sm:$0xff] %v1253_v31 }
 0x1b1 PF: > { %s14_s15 = sadd.s32 1, %s1821_s15  }
 0x1b2   : > { %p11_p4 = scmp.ge.s32.totalorder %s14_s15, 6  }
 0x1b4   :  { %13 = sbr.rel (!%p11_p4) target bundleno = 1 (0x1), region = 66 }

</bundles_post_ra>
